<compile_context>
chip_gen: v5e
topology: v5e:2x2
jax: 0.10.0
libtpu: 0.0.40
codegen_flags: <defaults>
</compile_context>

<pallas_src>
import functools

import jax
import jax.numpy as jnp
import numpy as np
from jax import lax
from jax.experimental import pallas as pl
from jax.experimental.pallas import tpu as pltpu


# ----------------------------------------------------------------------------
# Pallas kernel: one LSTM layer, whole sequence in a single invocation.
# ----------------------------------------------------------------------------
def lstm_layer_kernel(x_ref, wih_ref, whh_ref, b_ref, h0_ref, c0_ref, hN_ref,
                      *, seq_len, batch, hidden):
    """Single LSTM layer over the full sequence.

    x_ref   : (T*B, D)   inputs, fully resident in VMEM
    wih_ref : (D, 4H)    W_ih^T
    whh_ref : (H, 4H)    W_hh^T
    b_ref   : (1, 4H)    b_ih + b_hh
    h0_ref  : (B, H)     initial hidden state
    c0_ref  : (B, H)     initial cell state
    hN_ref  : (B, H)     OUT: final hidden state
    """
    T, B, H = seq_len, batch, hidden

    # Hoisted input projection: one MXU matmul covering all T timesteps,
    # plus the combined bias.  No sequential dependence -> off the serial path.
    gates_pre = (jnp.dot(x_ref[...], wih_ref[...],
                         preferred_element_type=jnp.float32)
                 + b_ref[...])                                  # (T*B, 4H)

    # Pre-split into per-step rows (static sublane slices, independent of h,
    # so they cannot be serialized behind the previous step's EUP work).
    gate_rows = [gates_pre[t * B:(t + 1) * B, :] for t in range(T)]

    whh = whh_ref[...]                                          # (H, 4H)
    h = h0_ref[...].astype(jnp.float32)                         # (B, H)
    c = c0_ref[...].astype(jnp.float32)                         # (B, H)

    # Fully unrolled recurrence (T is a small static Python int).  Only the
    # recurrent matmul + 3 transcendentals sit on the serial critical path.
    for t in range(T):
        gates = gate_rows[t] + jnp.dot(h, whh,
                                       preferred_element_type=jnp.float32)
        # Collapsed nonlinearities: one sigmoid over all 4H lanes (covers the
        # i/f/o gates) + one tanh over all 4H lanes (covers the g gate),
        # instead of four separate 32-lane transcendentals.  The per-gate
        # alignment below is static lane slicing (XLU), not EUP work.
        sig = jax.nn.sigmoid(gates)                             # (B, 4H)
        tg = jnp.tanh(gates)                                    # (B, 4H)
        # PyTorch gate order [i, f, g, o]
        i_g = sig[:, 0 * H:1 * H]
        f_g = sig[:, 1 * H:2 * H]
        g_g = tg[:, 2 * H:3 * H]
        o_g = sig[:, 3 * H:4 * H]
        c = f_g * c + i_g * g_g
        h = o_g * jnp.tanh(c)                                   # 3rd EUP op

    # Single one-shot store of the final hidden state.
    hN_ref[...] = h.astype(hN_ref.dtype)


# ----------------------------------------------------------------------------
# Wrapper: run one LSTM layer, return only its final hidden state hN: (B, H).
# Expects pre-transposed weights / pre-summed bias (see prepare_layer_params).
# ----------------------------------------------------------------------------
def lstm_layer_final_h_pallas(x, wih_t, whh_t, bias, h0, c0):
    """x: (T, B, D) time-major.  wih_t: (D, 4H), whh_t: (H, 4H), bias: (1, 4H).
    h0, c0: (B, H).  Returns (B, H)."""
    T, B, D = x.shape
    H = h0.shape[-1]

    x2d = x.reshape(T * B, D)                       # fold time into rows

    kernel = functools.partial(lstm_layer_kernel,
                               seq_len=T, batch=B, hidden=H)
    vmem_spec = pl.BlockSpec(memory_space=pltpu.MemorySpace.VMEM)

    # Scalability guard for the all-resident design: size the scoped VMEM
    # limit from the real footprint (f32 words) with generous headroom.
    footprint = 4 * (T * B * D + T * B * 4 * H + D * 4 * H
                     + H * 4 * H + 4 * H + 4 * B * H)
    vmem_limit = int(max(8 * footprint, 2 * 1024 * 1024))

    hN = pl.pallas_call(
        kernel,
        out_shape=jax.ShapeDtypeStruct((B, H), jnp.float32),
        in_specs=[vmem_spec] * 6,
        out_specs=vmem_spec,
        compiler_params=pltpu.CompilerParams(vmem_limit_bytes=vmem_limit),
    )(x2d, wih_t, whh_t, bias, h0, c0)
    return hN


# ----------------------------------------------------------------------------
# One-time parameter preparation (outside the per-call path).
# ----------------------------------------------------------------------------
def prepare_layer_params(w_ih, w_hh, b_ih, b_hh):
    """Fold PyTorch-layout weights into kernel layout once at setup time."""
    wih_t = jnp.asarray(w_ih).T                     # (D, 4H)
    whh_t = jnp.asarray(w_hh).T                     # (H, 4H)
    bias = (jnp.asarray(b_ih) + jnp.asarray(b_hh)).reshape(1, -1)  # (1, 4H)
    return wih_t, whh_t, bias


# ----------------------------------------------------------------------------
# Module-level forward (jitted: any residual glue fuses around the kernel).
#
# orthogonalLSTM.forward returns hn[0], i.e. the final hidden state of layer 0
# only.  hn[0] depends solely on layer 0's weights and (h0[0], c0[0]), so
# layers > 0 are dead code for this output and are intentionally not computed.
# ----------------------------------------------------------------------------
@jax.jit
def orthogonal_lstm_forward(x, wih_t, whh_t, bias, h0_all, c0_all):
    """x: (T, B, D).  wih_t/whh_t/bias: layer-0 prepared params.
    h0_all/c0_all: (num_layer, B, H).  Returns hn[0] of shape (B, H)."""
    return lstm_layer_final_h_pallas(x, wih_t, whh_t, bias,
                                     h0_all[0], c0_all[0])


# ----------------------------------------------------------------------------
# Pure-JAX reference (full multi-layer lax.scan stack) for correctness check.
# ----------------------------------------------------------------------------
def lstm_layer_ref(x, w_ih, w_hh, b_ih, b_hh, h0, c0):
    H = h0.shape[-1]

    def step(carry, x_t):
        h, c = carry
        gates = x_t @ w_ih.T + h @ w_hh.T + b_ih + b_hh
        i = jax.nn.sigmoid(gates[:, 0 * H:1 * H])
        f = jax.nn.sigmoid(gates[:, 1 * H:2 * H])
        g = jnp.tanh(gates[:, 2 * H:3 * H])
        o = jax.nn.sigmoid(gates[:, 3 * H:4 * H])
        c = f * c + i * g
        h = o * jnp.tanh(c)
        return (h, c), h

    (hN, cN), y = lax.scan(step, (h0, c0), x)
    return y, hN, cN


def forward_ref(x, params, h0_all, c0_all):
    """Runs the full multi-layer stack (like nn.LSTM) and returns hn[0]."""
    inp = x
    hn = []
    for layer, (w_ih, w_hh, b_ih, b_hh) in enumerate(params):
        y, hN, _ = lstm_layer_ref(inp, w_ih, w_hh, b_ih, b_hh,
                                  h0_all[layer], c0_all[layer])
        hn.append(hN)
        inp = y
    return hn[0]


# ----------------------------------------------------------------------------
# Main
# ----------------------------------------------------------------------------
if __name__ == "__main__":
    INPUT_DIM = 16
    HIDDEN_DIM = 32
    NUM_LAYER = 2
    SEQ = 8
    BATCH = 1   # module implies batch 1 (hn_0 = randn(num_layer, 1, hidden_dim))

    key = jax.random.PRNGKey(0)
    keys = jax.random.split(key, 4 * NUM_LAYER + 3)

    # PyTorch nn.LSTM init: uniform(-1/sqrt(H), 1/sqrt(H)) for weights & biases.
    bound = 1.0 / np.sqrt(HIDDEN_DIM)
    params = []
    for layer in range(NUM_LAYER):
        d_in = INPUT_DIM if layer == 0 else HIDDEN_DIM
        k0, k1, k2, k3 = keys[4 * layer: 4 * layer + 4]
        w_ih = jax.random.uniform(k0, (4 * HIDDEN_DIM, d_in),
                                  jnp.float32, -bound, bound)
        w_hh = jax.random.uniform(k1, (4 * HIDDEN_DIM, HIDDEN_DIM),
                                  jnp.float32, -bound, bound)
        b_ih = jax.random.uniform(k2, (4 * HIDDEN_DIM,),
                                  jnp.float32, -bound, bound)
        b_hh = jax.random.uniform(k3, (4 * HIDDEN_DIM,),
                                  jnp.float32, -bound, bound)
        params.append((w_ih, w_hh, b_ih, b_hh))

    # torch.randn initial states -> deterministic normal draws here.
    h0_all = jax.random.normal(keys[-3], (NUM_LAYER, BATCH, HIDDEN_DIM),
                               jnp.float32)
    c0_all = jax.random.normal(keys[-2], (NUM_LAYER, BATCH, HIDDEN_DIM),
                               jnp.float32)

    # Input sequence: (seq_len, batch, input_dim), time-major like nn.LSTM.
    x = jax.random.normal(keys[-1], (SEQ, BATCH, INPUT_DIM), jnp.float32)

    # One-time parameter prep (only layer 0 is needed for hn[0]).
    wih_t, whh_t, bias = prepare_layer_params(*params[0])

    out = orthogonal_lstm_forward(x, wih_t, whh_t, bias, h0_all, c0_all)
    out = jax.block_until_ready(out)

    # Reference runs the FULL 2-layer stack and returns hn[0] -> must match the
    # layer-0-only Pallas path.
    ref = forward_ref(x, params, h0_all, c0_all)
    np.testing.assert_allclose(np.asarray(out), np.asarray(ref),
                               rtol=1e-5, atol=1e-5)
    assert out.shape == (BATCH, HIDDEN_DIM)

    print("KERNEL_OK")
</pallas_src>

<mosaic_0001>
module attributes {stable_mosaic.version = 11 : i64} {
  func.func @lstm_layer_kernel(%arg0: memref<8x16xf32, #tpu.memory_space<vmem>>, %arg1: memref<16x128xf32, #tpu.memory_space<vmem>>, %arg2: memref<32x128xf32, #tpu.memory_space<vmem>>, %arg3: memref<1x128xf32, #tpu.memory_space<vmem>>, %arg4: memref<1x32xf32, #tpu.memory_space<vmem>>, %arg5: memref<1x32xf32, #tpu.memory_space<vmem>>, %arg6: memref<1x32xf32, #tpu.memory_space<vmem>>) attributes {dimension_semantics = [], scalar_prefetch = 0 : i64, scratch_operands = 0 : i64, tpu.core_type = #tpu.core_type<tc>} {
    %c0 = arith.constant 0 : index
    %c0_0 = arith.constant 0 : index
    %0 = vector.load %arg0[%c0, %c0_0] : memref<8x16xf32, #tpu.memory_space<vmem>>, vector<8x16xf32>
    %c0_1 = arith.constant 0 : index
    %c0_2 = arith.constant 0 : index
    %1 = vector.load %arg1[%c0_1, %c0_2] : memref<16x128xf32, #tpu.memory_space<vmem>>, vector<16x128xf32>
    %cst = arith.constant dense<0.000000e+00> : vector<8x128xf32>
    %2 = tpu.matmul %0, %1, %cst {dimension_numbers = #tpu.dot_dimension_numbers<[1], [0], [0], [1], [0, 0, 1, 1], [], []>} : vector<8x16xf32>, vector<16x128xf32>, vector<8x128xf32> -> vector<8x128xf32>
    %c0_3 = arith.constant 0 : index
    %c0_4 = arith.constant 0 : index
    %3 = vector.load %arg3[%c0_3, %c0_4] : memref<1x128xf32, #tpu.memory_space<vmem>>, vector<1x128xf32>
    %4 = vector.broadcast %3 : vector<1x128xf32> to vector<8x128xf32>
    %5 = arith.addf %2, %4 : vector<8x128xf32>
    %6 = vector.extract_strided_slice %5 {offsets = [0, 0], sizes = [1, 128], strides = [1, 1]} : vector<8x128xf32> to vector<1x128xf32>
    %7 = vector.extract_strided_slice %5 {offsets = [1, 0], sizes = [1, 128], strides = [1, 1]} : vector<8x128xf32> to vector<1x128xf32>
    %8 = vector.extract_strided_slice %5 {offsets = [2, 0], sizes = [1, 128], strides = [1, 1]} : vector<8x128xf32> to vector<1x128xf32>
    %9 = vector.extract_strided_slice %5 {offsets = [3, 0], sizes = [1, 128], strides = [1, 1]} : vector<8x128xf32> to vector<1x128xf32>
    %10 = vector.extract_strided_slice %5 {offsets = [4, 0], sizes = [1, 128], strides = [1, 1]} : vector<8x128xf32> to vector<1x128xf32>
    %11 = vector.extract_strided_slice %5 {offsets = [5, 0], sizes = [1, 128], strides = [1, 1]} : vector<8x128xf32> to vector<1x128xf32>
    %12 = vector.extract_strided_slice %5 {offsets = [6, 0], sizes = [1, 128], strides = [1, 1]} : vector<8x128xf32> to vector<1x128xf32>
    %13 = vector.extract_strided_slice %5 {offsets = [7, 0], sizes = [1, 128], strides = [1, 1]} : vector<8x128xf32> to vector<1x128xf32>
    %c0_5 = arith.constant 0 : index
    %c0_6 = arith.constant 0 : index
    %14 = vector.load %arg2[%c0_5, %c0_6] : memref<32x128xf32, #tpu.memory_space<vmem>>, vector<32x128xf32>
    %c0_7 = arith.constant 0 : index
    %c0_8 = arith.constant 0 : index
    %15 = vector.load %arg4[%c0_7, %c0_8] : memref<1x32xf32, #tpu.memory_space<vmem>>, vector<1x32xf32>
    %c0_9 = arith.constant 0 : index
    %c0_10 = arith.constant 0 : index
    %16 = vector.load %arg5[%c0_9, %c0_10] : memref<1x32xf32, #tpu.memory_space<vmem>>, vector<1x32xf32>
    %cst_11 = arith.constant dense<0.000000e+00> : vector<1x128xf32>
    %17 = tpu.matmul %15, %14, %cst_11 {dimension_numbers = #tpu.dot_dimension_numbers<[1], [0], [0], [1], [0, 0, 1, 1], [], []>} : vector<1x32xf32>, vector<32x128xf32>, vector<1x128xf32> -> vector<1x128xf32>
    %18 = arith.addf %6, %17 : vector<1x128xf32>
    %19 = arith.negf %18 : vector<1x128xf32>
    %20 = math.exp %19 : vector<1x128xf32>
    %cst_12 = arith.constant 1.000000e+00 : f32
    %21 = vector.broadcast %cst_12 : f32 to vector<1x128xf32>
    %22 = arith.addf %21, %20 : vector<1x128xf32>
    %23 = arith.divf %21, %22 : vector<1x128xf32>
    %24 = math.tanh %18 : vector<1x128xf32>
    %25 = vector.extract_strided_slice %23 {offsets = [0, 0], sizes = [1, 32], strides = [1, 1]} : vector<1x128xf32> to vector<1x32xf32>
    %26 = vector.extract_strided_slice %23 {offsets = [0, 32], sizes = [1, 32], strides = [1, 1]} : vector<1x128xf32> to vector<1x32xf32>
    %27 = vector.extract_strided_slice %24 {offsets = [0, 64], sizes = [1, 32], strides = [1, 1]} : vector<1x128xf32> to vector<1x32xf32>
    %28 = vector.extract_strided_slice %23 {offsets = [0, 96], sizes = [1, 32], strides = [1, 1]} : vector<1x128xf32> to vector<1x32xf32>
    %29 = arith.mulf %26, %16 : vector<1x32xf32>
    %30 = arith.mulf %25, %27 : vector<1x32xf32>
    %31 = arith.addf %29, %30 : vector<1x32xf32>
    %32 = math.tanh %31 : vector<1x32xf32>
    %33 = arith.mulf %28, %32 : vector<1x32xf32>
    %cst_13 = arith.constant dense<0.000000e+00> : vector<1x128xf32>
    %34 = tpu.matmul %33, %14, %cst_13 {dimension_numbers = #tpu.dot_dimension_numbers<[1], [0], [0], [1], [0, 0, 1, 1], [], []>} : vector<1x32xf32>, vector<32x128xf32>, vector<1x128xf32> -> vector<1x128xf32>
    %35 = arith.addf %7, %34 : vector<1x128xf32>
    %36 = arith.negf %35 : vector<1x128xf32>
    %37 = math.exp %36 : vector<1x128xf32>
    %cst_14 = arith.constant 1.000000e+00 : f32
    %38 = vector.broadcast %cst_14 : f32 to vector<1x128xf32>
    %39 = arith.addf %38, %37 : vector<1x128xf32>
    %40 = arith.divf %38, %39 : vector<1x128xf32>
    %41 = math.tanh %35 : vector<1x128xf32>
    %42 = vector.extract_strided_slice %40 {offsets = [0, 0], sizes = [1, 32], strides = [1, 1]} : vector<1x128xf32> to vector<1x32xf32>
    %43 = vector.extract_strided_slice %40 {offsets = [0, 32], sizes = [1, 32], strides = [1, 1]} : vector<1x128xf32> to vector<1x32xf32>
    %44 = vector.extract_strided_slice %41 {offsets = [0, 64], sizes = [1, 32], strides = [1, 1]} : vector<1x128xf32> to vector<1x32xf32>
    %45 = vector.extract_strided_slice %40 {offsets = [0, 96], sizes = [1, 32], strides = [1, 1]} : vector<1x128xf32> to vector<1x32xf32>
    %46 = arith.mulf %43, %31 : vector<1x32xf32>
    %47 = arith.mulf %42, %44 : vector<1x32xf32>
    %48 = arith.addf %46, %47 : vector<1x32xf32>
    %49 = math.tanh %48 : vector<1x32xf32>
    %50 = arith.mulf %45, %49 : vector<1x32xf32>
    %cst_15 = arith.constant dense<0.000000e+00> : vector<1x128xf32>
    %51 = tpu.matmul %50, %14, %cst_15 {dimension_numbers = #tpu.dot_dimension_numbers<[1], [0], [0], [1], [0, 0, 1, 1], [], []>} : vector<1x32xf32>, vector<32x128xf32>, vector<1x128xf32> -> vector<1x128xf32>
    %52 = arith.addf %8, %51 : vector<1x128xf32>
    %53 = arith.negf %52 : vector<1x128xf32>
    %54 = math.exp %53 : vector<1x128xf32>
    %cst_16 = arith.constant 1.000000e+00 : f32
    %55 = vector.broadcast %cst_16 : f32 to vector<1x128xf32>
    %56 = arith.addf %55, %54 : vector<1x128xf32>
    %57 = arith.divf %55, %56 : vector<1x128xf32>
    %58 = math.tanh %52 : vector<1x128xf32>
    %59 = vector.extract_strided_slice %57 {offsets = [0, 0], sizes = [1, 32], strides = [1, 1]} : vector<1x128xf32> to vector<1x32xf32>
    %60 = vector.extract_strided_slice %57 {offsets = [0, 32], sizes = [1, 32], strides = [1, 1]} : vector<1x128xf32> to vector<1x32xf32>
    %61 = vector.extract_strided_slice %58 {offsets = [0, 64], sizes = [1, 32], strides = [1, 1]} : vector<1x128xf32> to vector<1x32xf32>
    %62 = vector.extract_strided_slice %57 {offsets = [0, 96], sizes = [1, 32], strides = [1, 1]} : vector<1x128xf32> to vector<1x32xf32>
    %63 = arith.mulf %60, %48 : vector<1x32xf32>
    %64 = arith.mulf %59, %61 : vector<1x32xf32>
    %65 = arith.addf %63, %64 : vector<1x32xf32>
    %66 = math.tanh %65 : vector<1x32xf32>
    %67 = arith.mulf %62, %66 : vector<1x32xf32>
    %cst_17 = arith.constant dense<0.000000e+00> : vector<1x128xf32>
    %68 = tpu.matmul %67, %14, %cst_17 {dimension_numbers = #tpu.dot_dimension_numbers<[1], [0], [0], [1], [0, 0, 1, 1], [], []>} : vector<1x32xf32>, vector<32x128xf32>, vector<1x128xf32> -> vector<1x128xf32>
    %69 = arith.addf %9, %68 : vector<1x128xf32>
    %70 = arith.negf %69 : vector<1x128xf32>
    %71 = math.exp %70 : vector<1x128xf32>
    %cst_18 = arith.constant 1.000000e+00 : f32
    %72 = vector.broadcast %cst_18 : f32 to vector<1x128xf32>
    %73 = arith.addf %72, %71 : vector<1x128xf32>
    %74 = arith.divf %72, %73 : vector<1x128xf32>
    %75 = math.tanh %69 : vector<1x128xf32>
    %76 = vector.extract_strided_slice %74 {offsets = [0, 0], sizes = [1, 32], strides = [1, 1]} : vector<1x128xf32> to vector<1x32xf32>
    %77 = vector.extract_strided_slice %74 {offsets = [0, 32], sizes = [1, 32], strides = [1, 1]} : vector<1x128xf32> to vector<1x32xf32>
    %78 = vector.extract_strided_slice %75 {offsets = [0, 64], sizes = [1, 32], strides = [1, 1]} : vector<1x128xf32> to vector<1x32xf32>
    %79 = vector.extract_strided_slice %74 {offsets = [0, 96], sizes = [1, 32], strides = [1, 1]} : vector<1x128xf32> to vector<1x32xf32>
    %80 = arith.mulf %77, %65 : vector<1x32xf32>
    %81 = arith.mulf %76, %78 : vector<1x32xf32>
    %82 = arith.addf %80, %81 : vector<1x32xf32>
    %83 = math.tanh %82 : vector<1x32xf32>
    %84 = arith.mulf %79, %83 : vector<1x32xf32>
    %cst_19 = arith.constant dense<0.000000e+00> : vector<1x128xf32>
    %85 = tpu.matmul %84, %14, %cst_19 {dimension_numbers = #tpu.dot_dimension_numbers<[1], [0], [0], [1], [0, 0, 1, 1], [], []>} : vector<1x32xf32>, vector<32x128xf32>, vector<1x128xf32> -> vector<1x128xf32>
    %86 = arith.addf %10, %85 : vector<1x128xf32>
    %87 = arith.negf %86 : vector<1x128xf32>
    %88 = math.exp %87 : vector<1x128xf32>
    %cst_20 = arith.constant 1.000000e+00 : f32
    %89 = vector.broadcast %cst_20 : f32 to vector<1x128xf32>
    %90 = arith.addf %89, %88 : vector<1x128xf32>
    %91 = arith.divf %89, %90 : vector<1x128xf32>
    %92 = math.tanh %86 : vector<1x128xf32>
    %93 = vector.extract_strided_slice %91 {offsets = [0, 0], sizes = [1, 32], strides = [1, 1]} : vector<1x128xf32> to vector<1x32xf32>
    %94 = vector.extract_strided_slice %91 {offsets = [0, 32], sizes = [1, 32], strides = [1, 1]} : vector<1x128xf32> to vector<1x32xf32>
    %95 = vector.extract_strided_slice %92 {offsets = [0, 64], sizes = [1, 32], strides = [1, 1]} : vector<1x128xf32> to vector<1x32xf32>
    %96 = vector.extract_strided_slice %91 {offsets = [0, 96], sizes = [1, 32], strides = [1, 1]} : vector<1x128xf32> to vector<1x32xf32>
    %97 = arith.mulf %94, %82 : vector<1x32xf32>
    %98 = arith.mulf %93, %95 : vector<1x32xf32>
    %99 = arith.addf %97, %98 : vector<1x32xf32>
    %100 = math.tanh %99 : vector<1x32xf32>
    %101 = arith.mulf %96, %100 : vector<1x32xf32>
    %cst_21 = arith.constant dense<0.000000e+00> : vector<1x128xf32>
    %102 = tpu.matmul %101, %14, %cst_21 {dimension_numbers = #tpu.dot_dimension_numbers<[1], [0], [0], [1], [0, 0, 1, 1], [], []>} : vector<1x32xf32>, vector<32x128xf32>, vector<1x128xf32> -> vector<1x128xf32>
    %103 = arith.addf %11, %102 : vector<1x128xf32>
    %104 = arith.negf %103 : vector<1x128xf32>
    %105 = math.exp %104 : vector<1x128xf32>
    %cst_22 = arith.constant 1.000000e+00 : f32
    %106 = vector.broadcast %cst_22 : f32 to vector<1x128xf32>
    %107 = arith.addf %106, %105 : vector<1x128xf32>
    %108 = arith.divf %106, %107 : vector<1x128xf32>
    %109 = math.tanh %103 : vector<1x128xf32>
    %110 = vector.extract_strided_slice %108 {offsets = [0, 0], sizes = [1, 32], strides = [1, 1]} : vector<1x128xf32> to vector<1x32xf32>
    %111 = vector.extract_strided_slice %108 {offsets = [0, 32], sizes = [1, 32], strides = [1, 1]} : vector<1x128xf32> to vector<1x32xf32>
    %112 = vector.extract_strided_slice %109 {offsets = [0, 64], sizes = [1, 32], strides = [1, 1]} : vector<1x128xf32> to vector<1x32xf32>
    %113 = vector.extract_strided_slice %108 {offsets = [0, 96], sizes = [1, 32], strides = [1, 1]} : vector<1x128xf32> to vector<1x32xf32>
    %114 = arith.mulf %111, %99 : vector<1x32xf32>
    %115 = arith.mulf %110, %112 : vector<1x32xf32>
    %116 = arith.addf %114, %115 : vector<1x32xf32>
    %117 = math.tanh %116 : vector<1x32xf32>
    %118 = arith.mulf %113, %117 : vector<1x32xf32>
    %cst_23 = arith.constant dense<0.000000e+00> : vector<1x128xf32>
    %119 = tpu.matmul %118, %14, %cst_23 {dimension_numbers = #tpu.dot_dimension_numbers<[1], [0], [0], [1], [0, 0, 1, 1], [], []>} : vector<1x32xf32>, vector<32x128xf32>, vector<1x128xf32> -> vector<1x128xf32>
    %120 = arith.addf %12, %119 : vector<1x128xf32>
    %121 = arith.negf %120 : vector<1x128xf32>
    %122 = math.exp %121 : vector<1x128xf32>
    %cst_24 = arith.constant 1.000000e+00 : f32
    %123 = vector.broadcast %cst_24 : f32 to vector<1x128xf32>
    %124 = arith.addf %123, %122 : vector<1x128xf32>
    %125 = arith.divf %123, %124 : vector<1x128xf32>
    %126 = math.tanh %120 : vector<1x128xf32>
    %127 = vector.extract_strided_slice %125 {offsets = [0, 0], sizes = [1, 32], strides = [1, 1]} : vector<1x128xf32> to vector<1x32xf32>
    %128 = vector.extract_strided_slice %125 {offsets = [0, 32], sizes = [1, 32], strides = [1, 1]} : vector<1x128xf32> to vector<1x32xf32>
    %129 = vector.extract_strided_slice %126 {offsets = [0, 64], sizes = [1, 32], strides = [1, 1]} : vector<1x128xf32> to vector<1x32xf32>
    %130 = vector.extract_strided_slice %125 {offsets = [0, 96], sizes = [1, 32], strides = [1, 1]} : vector<1x128xf32> to vector<1x32xf32>
    %131 = arith.mulf %128, %116 : vector<1x32xf32>
    %132 = arith.mulf %127, %129 : vector<1x32xf32>
    %133 = arith.addf %131, %132 : vector<1x32xf32>
    %134 = math.tanh %133 : vector<1x32xf32>
    %135 = arith.mulf %130, %134 : vector<1x32xf32>
    %cst_25 = arith.constant dense<0.000000e+00> : vector<1x128xf32>
    %136 = tpu.matmul %135, %14, %cst_25 {dimension_numbers = #tpu.dot_dimension_numbers<[1], [0], [0], [1], [0, 0, 1, 1], [], []>} : vector<1x32xf32>, vector<32x128xf32>, vector<1x128xf32> -> vector<1x128xf32>
    %137 = arith.addf %13, %136 : vector<1x128xf32>
    %138 = arith.negf %137 : vector<1x128xf32>
    %139 = math.exp %138 : vector<1x128xf32>
    %cst_26 = arith.constant 1.000000e+00 : f32
    %140 = vector.broadcast %cst_26 : f32 to vector<1x128xf32>
    %141 = arith.addf %140, %139 : vector<1x128xf32>
    %142 = arith.divf %140, %141 : vector<1x128xf32>
    %143 = math.tanh %137 : vector<1x128xf32>
    %144 = vector.extract_strided_slice %142 {offsets = [0, 0], sizes = [1, 32], strides = [1, 1]} : vector<1x128xf32> to vector<1x32xf32>
    %145 = vector.extract_strided_slice %142 {offsets = [0, 32], sizes = [1, 32], strides = [1, 1]} : vector<1x128xf32> to vector<1x32xf32>
    %146 = vector.extract_strided_slice %143 {offsets = [0, 64], sizes = [1, 32], strides = [1, 1]} : vector<1x128xf32> to vector<1x32xf32>
    %147 = vector.extract_strided_slice %142 {offsets = [0, 96], sizes = [1, 32], strides = [1, 1]} : vector<1x128xf32> to vector<1x32xf32>
    %148 = arith.mulf %145, %133 : vector<1x32xf32>
    %149 = arith.mulf %144, %146 : vector<1x32xf32>
    %150 = arith.addf %148, %149 : vector<1x32xf32>
    %151 = math.tanh %150 : vector<1x32xf32>
    %152 = arith.mulf %147, %151 : vector<1x32xf32>
    %c0_27 = arith.constant 0 : index
    %c0_28 = arith.constant 0 : index
    %153 = vector.load %arg6[%c0_27, %c0_28] : memref<1x32xf32, #tpu.memory_space<vmem>>, vector<1x32xf32>
    tpu.vector_store %arg6[%c0_27, %c0_28], %152 {strides = array<i32>} : memref<1x32xf32, #tpu.memory_space<vmem>>, vector<1x32xf32>,
    return
  }
}

</mosaic_0001>

<bundles_post_ra>
// kernel: orthogonal_lstm_forward.1
= control target key start
LH: loop header
LB: loop body
LE: loop exit
PB: predicated region body
PF: predicated region fallthrough
CT: control target
= control target key end

     0   :  { %11 = vsyncpa [#allocation3], 0  ;;  %s994_s0 = inlined_call_operand.hbm [shape: f32[8,16], index: 0, kind: input, shape index: {}]   ;;  %s995_s1 = inlined_call_operand.hbm [shape: f32[16,128], index: 1, kind: input, shape index: {}]   ;;  %s996_s2 = inlined_call_operand.hbm [shape: f32[32,128], index: 2, kind: input, shape index: {}]   ;;  %s997_s3 = inlined_call_operand.vmem [shape: f32[1,128], index: 3, kind: input, shape index: {}]   ;;  %s998_s4 = inlined_call_operand.vmem [shape: f32[1,32], index: 4, kind: input, shape index: {}]   ;;  %s999_s5 = inlined_call_operand.vmem [shape: f32[1,32], index: 5, kind: input, shape index: {}]   ;;  %s1000_s6 = inlined_call_operand.hbm [shape: f32[1,32], index: 6, kind: output, shape index: {}]  }
   0x1   :  { %12 = vsyncpa [#allocation6], 0  ;;  %s29_s23 = sshll.u32 %s995_s1, 4  ;;  %s30_s23 = int_to_ptr.hbm [resolvable:$true] %s29_s23 }
   0x2   :  { %13 = vsyncpa [#allocation4], 0  ;;  %s879_s24 = smov [#allocation5]   ;;  %s19_s28 = sshll.u32 %s994_s0, 4  ;;  %s20_s28 = int_to_ptr.hbm [resolvable:$true] %s19_s28 }
   0x3   :  { %s31_s25 = sshll.u32 %s879_s24, 4  ;;  %s880_s29 = smov 128   ;;  %s32_s25 = int_to_ptr.vmem [resolvable:$true] %s31_s25 }
   0x4   :  { %s881_s30 = smov 8   ;;  %s882_s7 = smov [#allocation2]  }
   0x5   :  { %37 = dma.hbm_to_vmem [thread:$0]  %s30_s23, 256, %s32_s25, [#allocation6], %s880_s29, %s880_s29, %s881_s30  }
   0x6   :  { %s21_s8 = sshll.u32 %s882_s7, 4  ;;  %s42_s11 = sshll.u32 %s996_s2, 4  ;;  %s22_s8 = int_to_ptr.vmem [resolvable:$true] %s21_s8  ;;  %s43_s11 = int_to_ptr.hbm [resolvable:$true] %s42_s11 }
   0x7   :  { %24 = dma.hbm_to_vmem [thread:$0]  %s20_s28, 128, %s22_s8, [#allocation3]  }
   0x8   :  { %s883_s1 = smov [#allocation7]  }
   0x9   :  { %s44_s12 = sshll.u32 %s883_s1, 4  ;;  %s45_s12 = int_to_ptr.vmem [resolvable:$true] %s44_s12 }
   0xa   :  { %50 = dma.hbm_to_vmem [thread:$0]  %s43_s11, 512, %s45_s12, [#allocation6], %s880_s29, %s880_s29, %s881_s30  }
   0xb   :  { %873 = dma.done.wait [#allocation3], 128  }
   0xc   :  { %874 = vsyncadd [#allocation3], 4294967168 }
   0xd   :  { %875 = dma.done.wait [#allocation6], 768  }
   0xe   :  { %876 = vsyncadd [#allocation6], 4294966528  ;;  %v103_v0 = vld [vmem:[#allocation7 + $0x18] sm:$0xff]  ;;  %v102_v2 = vld [vmem:[#allocation7 + $0x10] sm:$0xff]  ;;  %vm76_vm0 = vcmask 130048   ;;  %vm106_vm1 = vcmask 261120  }
   0xf   :  { %v71_v1 = vld [vmem:[#allocation5 + $0x8] sm:$0xff]  ;;  %122 = vmatpush.msra.mxu1 %v103_v0  ;;  %v70_v3 = vld [vmem:[#allocation5] sm:$0xff]  ;;  %v69_v4 = vld [vmem:[#allocation2] sm:$0xff]  ;;  %190 = vmatpush.msra.mxu2 %v103_v0  ;;  %s884_s14 = smov 64   ;;  %s885_s17 = smov 32  }
  0x10   :  { %94 = vmatpush.msra.mxu0 %v71_v1  ;;  %v101_v5 = vld [vmem:[#allocation7 + $0x8] sm:$0xff]  ;;  %260 = vmatpush.msra.mxu3 %v103_v0  ;;  %v100_v6 = vld [vmem:[#allocation7] sm:$0xff]  ;;  %s675_s20 = sshll.u32 %s1000_s6, 4  ;;  %s676_s20 = int_to_ptr.hbm [resolvable:$true] %s675_s20 }
  0x11   :  { %123 = vmatpush.msra.mxu1 %v102_v2  ;;  %191 = vmatpush.msra.mxu2 %v102_v2  ;;  %v104_v7 = vld [vmem:[%s998_s4] sm:$0x1] }
  0x12   :  { %95 = vmatpush.msra.mxu0 %v70_v3  ;;  %261 = vmatpush.msra.mxu3 %v102_v2  ;;  %v711_v8 = vld [vmem:[%s997_s3] ss:$0 sm:$0xff]  ;;  %s886_s3 = smov [#allocation8]  }
  0x13   :  { %686 = vmatmul.msk.f32.vlgmr.msra.gmra.mxu0 %vm76_vm0, %v69_v4  ;;  %124 = vmatpush.msra.mxu1 %v101_v5  ;;  %v712_v14 = vld [vmem:[%s999_s5] ss:$0 sm:$0xff]  ;;  %s673_s5 = sshll.u32 %s886_s3, 4  ;;  %s674_s5 = int_to_ptr.vmem [resolvable:$true] %s673_s5 }
  0x14   :  { %192 = vmatpush.msra.mxu2 %v101_v5  ;;  %330 = vmatpush.msrb.mxu0 %v103_v0 }
  0x15   :  { %125 = vmatpush.msra.mxu1 %v100_v6  ;;  %262 = vmatpush.msra.mxu3 %v101_v5 }
  0x16   :  { %687 = vmatmul.msk.f32.vlgmr.msra.gmra.mxu1 %vm106_vm1, %v104_v7  ;;  %193 = vmatpush.msra.mxu2 %v100_v6 }
  0x17   :  { %263 = vmatpush.msra.mxu3 %v100_v6  ;;  %331 = vmatpush.msrb.mxu0 %v102_v2 }
  0x18   :  { %400 = vmatpush.msrb.mxu1 %v103_v0  ;;  %470 = vmatpush.msrb.mxu2 %v103_v0 }
  0x19   :  { %332 = vmatpush.msrb.mxu0 %v101_v5  ;;  %540 = vmatpush.msrb.mxu3 %v103_v0 }
  0x1a   :  { %401 = vmatpush.msrb.mxu1 %v102_v2  ;;  %471 = vmatpush.msrb.mxu2 %v102_v2 }
  0x1b   :  { %333 = vmatpush.msrb.mxu0 %v100_v6  ;;  %541 = vmatpush.msrb.mxu3 %v102_v2 }
  0x1c   :  { %402 = vmatpush.msrb.mxu1 %v101_v5  ;;  %472 = vmatpush.msrb.mxu2 %v101_v5 }
  0x1d   :  { %542 = vmatpush.msrb.mxu3 %v101_v5  ;;  %610 = vmatpush.msra.mxu0 %v103_v0 }
  0x1e   :  { %403 = vmatpush.msrb.mxu1 %v100_v6  ;;  %473 = vmatpush.msrb.mxu2 %v100_v6 }
  0x1f   :  { %543 = vmatpush.msrb.mxu3 %v100_v6  ;;  %611 = vmatpush.msra.mxu0 %v102_v2 }
  0x21   :  { %612 = vmatpush.msra.mxu0 %v101_v5 }
  0x23   :  { %613 = vmatpush.msra.mxu0 %v100_v6 }
  0x90   :  { %v97_v9 = vpop.f32.mrf.mxu0 }
  0x91   :  { %v938_v10 = vadd.f32 %v711_v8, %v97_v9 }
  0x93   :  { %v127_v11 = vpop.f32.mrf.mxu1 }
  0x94   :  { %v130_v12 = vadd.f32 %v127_v11, %v938_v10 }
  0x96   :  { %713 = vtanh.f32 %v130_v12  ;;  %v688_v15 = vmul.f32 -1.442695, %v130_v12 }
  0x98   :  { %715 = vpow2.f32 %v688_v15 }
  0x9c   :  { %v714_v13 = vpop.eup %713 }
  0x9d   :  { %158 = vrot.lane.b32.xlu0 %v714_v13, %s884_s14 }
  0x9e   :  { %v716_v16 = vpop.eup %715 }
  0x9f   :  { %v134_v17 = vadd.f32 1.0, %v716_v16 }
  0xa1   :  { %717 = vrcp.f32 %v134_v17  ;;  %v146_v23 = vand.u32 2147483648, %v134_v17  ;;  %vm140_vm3 = vweird.f32 %v134_v17  ;;  %v144_v24 = vand.u32 2147483647, %v134_v17 }
  0xa3   :  { %v147_v26 = vor.u32 1.1754944e-38, %v146_v23  ;;  %vm145_vm5 = vcmp.eq.f32.partialorder %v144_v24, 8.507059e+37 }
  0xa5   :  { %153 = vrot.lane.b32.xlu0 %v712_v14, %s885_s17 }
  0xa7   :  { %v718_v18 = vpop.eup %717 }
  0xa8   :  { %v136_v19 = vmul.f32 %v718_v18, %v134_v17  ;;  %vm141_vm2 = vweird.f32 %v718_v18 }
  0xa9   :  { %vm142_vm4 = vmor %vm140_vm3, %vm141_vm2 }
  0xaa   :  { %v137_v20 = vsub.f32 1.0, %v136_v19 }
  0xac   :  { %v138_v21 = vmul.f32 %v718_v18, %v137_v20 }
  0xae   :  { %v139_v22 = vadd.f32 %v718_v18, %v138_v21 }
  0xb0   :  { %v143_v25 = vsel %vm142_vm4, %v718_v18, %v139_v22 }
  0xb1   :  { %v148_v28 = vsel %vm145_vm5, %v147_v26, %v143_v25 }
 0x10f   :  { %v159_v27 = vpop.permute.xlu0 %158 }
 0x110   :  { %v161_v29 = vmul.f32 %v159_v27, %v148_v28 }
 0x112   :  { %163 = vrot.lane.b32.xlu1 %v161_v29, %s885_s17 }
 0x117   :  { %v154_v30 = vpop.permute.xlu0 %153 }
 0x118   :  { %v156_v31 = vmul.f32 %v154_v30, %v148_v28 }
 0x184   :  { %v164_v32 = vpop.permute.xlu1 %163 }
 0x185   :  { %v166_v33 = vadd.f32 %v164_v32, %v156_v31 }
 0x187   :  { %719 = vtanh.f32 %v166_v33  ;;  %v223_v57 = vrot.slane %v166_v33, 7 }
 0x18d   :  { %v720_v34 = vpop.eup %719 }
 0x18e   :  { %169 = vrot.lane.b32.xlu1 %v720_v34, %s884_s14 }
 0x200   :  { %v170_v35 = vpop.permute.xlu1 %169 }
 0x201   :  { %v172_v36 = vmul.f32 %v170_v35, %v148_v28 }
 0x203   :  { %174 = vrot.lane.b32.xlu2 %v172_v36, %s885_s17 }
 0x25d   :  { %v175_v37 = vpop.permute.xlu2 %174 }
 0x25e   :  { %689 = vmatmul.msk.f32.vlgmr.msra.gmra.mxu2 %vm106_vm1, %v175_v37 }
 0x2e1   :  { %v195_v38 = vpop.f32.mrf.mxu2 }
 0x2e2   :  { %v199_v39 = vrot.slane %v195_v38, 7 }
 0x2e4   :  { %v201_v40 = vadd.f32 %v199_v39, %v938_v10 }
 0x2e6   :  { %721 = vtanh.f32 %v201_v40  ;;  %v690_v42 = vmul.f32 -1.442695, %v201_v40 }
 0x2e8   :  { %723 = vpow2.f32 %v690_v42 }
 0x2ec   :  { %v722_v41 = vpop.eup %721 }
 0x2ed   :  { %227 = vrot.lane.b32.xlu2 %v722_v41, %s884_s14 }
 0x2ee   :  { %v724_v43 = vpop.eup %723 }
 0x2ef   :  { %v205_v44 = vadd.f32 1.0, %v724_v43 }
 0x2f1   :  { %725 = vrcp.f32 %v205_v44  ;;  %v217_v50 = vand.u32 2147483648, %v205_v44  ;;  %vm211_vm7 = vweird.f32 %v205_v44  ;;  %v215_v51 = vand.u32 2147483647, %v205_v44 }
 0x2f3   :  { %v218_v53 = vor.u32 1.1754944e-38, %v217_v50  ;;  %vm216_vm9 = vcmp.eq.f32.partialorder %v215_v51, 8.507059e+37 }
 0x2f7   :  { %v726_v45 = vpop.eup %725 }
 0x2f8   :  { %v207_v46 = vmul.f32 %v726_v45, %v205_v44  ;;  %vm212_vm6 = vweird.f32 %v726_v45 }
 0x2f9   :  { %vm213_vm8 = vmor %vm211_vm7, %vm212_vm6 }
 0x2fa   :  { %v208_v47 = vsub.f32 1.0, %v207_v46 }
 0x2fc   :  { %v209_v48 = vmul.f32 %v726_v45, %v208_v47 }
 0x2fe   :  { %v210_v49 = vadd.f32 %v726_v45, %v209_v48 }
 0x300   :  { %v214_v52 = vsel %vm213_vm8, %v726_v45, %v210_v49 }
 0x301   :  { %v219_v55 = vsel %vm216_vm9, %v218_v53, %v214_v52 }
 0x302   :  { %v225_v58 = vmul.f32 %v223_v57, %v219_v55 }
 0x347   :  { %v228_v54 = vpop.permute.xlu2 %227 }
 0x348   :  { %v230_v56 = vmul.f32 %v228_v54, %v219_v55 }
 0x34a   :  { %232 = vrot.lane.b32.xlu0 %v230_v56, %s885_s17 }
 0x3bc   :  { %v233_v59 = vpop.permute.xlu0 %232 }
 0x3bd   :  { %v235_v60 = vadd.f32 %v233_v59, %v225_v58 }
 0x3bf   :  { %727 = vtanh.f32 %v235_v60  ;;  %v293_v22 = vrot.slane %v235_v60, 7 }
 0x3c5   :  { %v728_v61 = vpop.eup %727 }
 0x3c6   :  { %238 = vrot.lane.b32.xlu1 %v728_v61, %s884_s14 }
 0x438   :  { %v239_v62 = vpop.permute.xlu1 %238 }
 0x439   :  { %v241_v63 = vmul.f32 %v239_v62, %v219_v55 }
 0x43b   :  { %v243_v0 = vrot.slane %v241_v63, 1 }
 0x43d   :  { %244 = vrot.lane.b32.xlu2 %v243_v0, %s885_s17 }
 0x497   :  { %v245_v1 = vpop.permute.xlu2 %244 }
 0x498   :  { %691 = vmatmul.msk.f32.vlgmr.msra.gmra.mxu3 %vm106_vm1, %v245_v1 }
 0x51b   :  { %v265_v2 = vpop.f32.mrf.mxu3 }
 0x51c   :  { %v269_v3 = vrot.slane %v265_v2, 6 }
 0x51e   :  { %v271_v4 = vadd.f32 %v269_v3, %v938_v10 }
 0x520   :  { %729 = vtanh.f32 %v271_v4  ;;  %v692_v6 = vmul.f32 -1.442695, %v271_v4 }
 0x522   :  { %731 = vpow2.f32 %v692_v6 }
 0x526   :  { %v730_v5 = vpop.eup %729 }
 0x527   :  { %297 = vrot.lane.b32.xlu0 %v730_v5, %s884_s14 }
 0x528   :  { %v732_v7 = vpop.eup %731 }
 0x529   :  { %v275_v8 = vadd.f32 1.0, %v732_v7 }
 0x52b   :  { %733 = vrcp.f32 %v275_v8  ;;  %v287_v15 = vand.u32 2147483648, %v275_v8  ;;  %vm281_vm11 = vweird.f32 %v275_v8  ;;  %v285_v16 = vand.u32 2147483647, %v275_v8 }
 0x52d   :  { %v288_v18 = vor.u32 1.1754944e-38, %v287_v15  ;;  %vm286_vm13 = vcmp.eq.f32.partialorder %v285_v16, 8.507059e+37 }
 0x531   :  { %v734_v9 = vpop.eup %733 }
 0x532   :  { %v277_v11 = vmul.f32 %v734_v9, %v275_v8  ;;  %vm282_vm10 = vweird.f32 %v734_v9 }
 0x533   :  { %vm283_vm12 = vmor %vm281_vm11, %vm282_vm10 }
 0x534   :  { %v278_v12 = vsub.f32 1.0, %v277_v11 }
 0x536   :  { %v279_v13 = vmul.f32 %v734_v9, %v278_v12 }
 0x538   :  { %v280_v14 = vadd.f32 %v734_v9, %v279_v13 }
 0x53a   :  { %v284_v17 = vsel %vm283_vm12, %v734_v9, %v280_v14 }
 0x53b   :  { %v289_v20 = vsel %vm286_vm13, %v288_v18, %v284_v17 }
 0x53c   :  { %v295_v23 = vmul.f32 %v293_v22, %v289_v20 }
 0x599   :  { %v298_v19 = vpop.permute.xlu0 %297 }
 0x59a   :  { %v300_v21 = vmul.f32 %v298_v19, %v289_v20 }
 0x59c   :  { %302 = vrot.lane.b32.xlu1 %v300_v21, %s885_s17 }
 0x60e   :  { %v303_v24 = vpop.permute.xlu1 %302 }
 0x60f   :  { %v305_v25 = vadd.f32 %v303_v24, %v295_v23 }
 0x611   :  { %735 = vtanh.f32 %v305_v25  ;;  %v363_v50 = vrot.slane %v305_v25, 7 }
 0x617   :  { %v736_v26 = vpop.eup %735 }
 0x618   :  { %308 = vrot.lane.b32.xlu2 %v736_v26, %s884_s14 }
 0x672   :  { %v309_v27 = vpop.permute.xlu2 %308 }
 0x673   :  { %v311_v28 = vmul.f32 %v309_v27, %v289_v20 }
 0x675   :  { %v313_v29 = vrot.slane %v311_v28, 2 }
 0x677   :  { %314 = vrot.lane.b32.xlu0 %v313_v29, %s885_s17 }
 0x6e9   :  { %v315_v30 = vpop.permute.xlu0 %314 }
 0x6ea   :  { %693 = vmatmul.msk.f32.vlgmr.msrb.gmra.mxu0 %vm106_vm1, %v315_v30 }
 0x767   :  { %v335_v31 = vpop.f32.mrf.mxu0 }
 0x768   :  { %v339_v32 = vrot.slane %v335_v31, 5 }
 0x76a   :  { %v341_v33 = vadd.f32 %v339_v32, %v938_v10 }
 0x76c   :  { %737 = vtanh.f32 %v341_v33  ;;  %v694_v35 = vmul.f32 -1.442695, %v341_v33 }
 0x76e   :  { %739 = vpow2.f32 %v694_v35 }
 0x772   :  { %v738_v34 = vpop.eup %737 }
 0x773   :  { %367 = vrot.lane.b32.xlu1 %v738_v34, %s884_s14 }
 0x774   :  { %v740_v36 = vpop.eup %739 }
 0x775   :  { %v345_v37 = vadd.f32 1.0, %v740_v36 }
 0x777   :  { %741 = vrcp.f32 %v345_v37  ;;  %v357_v43 = vand.u32 2147483648, %v345_v37  ;;  %vm351_vm15 = vweird.f32 %v345_v37  ;;  %v355_v44 = vand.u32 2147483647, %v345_v37 }
 0x779   :  { %v358_v46 = vor.u32 1.1754944e-38, %v357_v43  ;;  %vm356_vm2 = vcmp.eq.f32.partialorder %v355_v44, 8.507059e+37 }
 0x77d   :  { %v742_v38 = vpop.eup %741 }
 0x77e   :  { %v347_v39 = vmul.f32 %v742_v38, %v345_v37  ;;  %vm352_vm14 = vweird.f32 %v742_v38 }
 0x77f   :  { %vm353_vm0 = vmor %vm351_vm15, %vm352_vm14 }
 0x780   :  { %v348_v40 = vsub.f32 1.0, %v347_v39 }
 0x782   :  { %v349_v41 = vmul.f32 %v742_v38, %v348_v40 }
 0x784   :  { %v350_v42 = vadd.f32 %v742_v38, %v349_v41 }
 0x786   :  { %v354_v45 = vsel %vm353_vm0, %v742_v38, %v350_v42 }
 0x787   :  { %v359_v48 = vsel %vm356_vm2, %v358_v46, %v354_v45 }
 0x788   :  { %v365_v51 = vmul.f32 %v363_v50, %v359_v48 }
 0x7e5   :  { %v368_v47 = vpop.permute.xlu1 %367 }
 0x7e6   :  { %v370_v49 = vmul.f32 %v368_v47, %v359_v48 }
 0x7e8   :  { %372 = vrot.lane.b32.xlu2 %v370_v49, %s885_s17 }
 0x842   :  { %v373_v52 = vpop.permute.xlu2 %372 }
 0x843   :  { %v375_v53 = vadd.f32 %v373_v52, %v365_v51 }
 0x845   :  { %743 = vtanh.f32 %v375_v53  ;;  %v433_v15 = vrot.slane %v375_v53, 7 }
 0x84b   :  { %v744_v54 = vpop.eup %743 }
 0x84c   :  { %378 = vrot.lane.b32.xlu0 %v744_v54, %s884_s14 }
 0x8be   :  { %v379_v55 = vpop.permute.xlu0 %378 }
 0x8bf   :  { %v381_v56 = vmul.f32 %v379_v55, %v359_v48 }
 0x8c1   :  { %v383_v57 = vrot.slane %v381_v56, 3 }
 0x8c3   :  { %384 = vrot.lane.b32.xlu1 %v383_v57, %s885_s17 }
 0x935   :  { %v385_v58 = vpop.permute.xlu1 %384 }
 0x936   :  { %695 = vmatmul.msk.f32.vlgmr.msrb.gmra.mxu1 %vm106_vm1, %v385_v58 }
 0x9b3   :  { %v405_v59 = vpop.f32.mrf.mxu1 }
 0x9b4   :  { %v409_v60 = vrot.slane %v405_v59, 4 }
 0x9b6   :  { %v411_v61 = vadd.f32 %v409_v60, %v938_v10 }
 0x9b8   :  { %745 = vtanh.f32 %v411_v61  ;;  %v696_v63 = vmul.f32 -1.442695, %v411_v61 }
 0x9ba   :  { %747 = vpow2.f32 %v696_v63 }
 0x9be   :  { %v746_v62 = vpop.eup %745 }
 0x9bf   :  { %437 = vrot.lane.b32.xlu2 %v746_v62, %s884_s14 }
 0x9c0   :  { %v748_v0 = vpop.eup %747 }
 0x9c1   :  { %v415_v1 = vadd.f32 1.0, %v748_v0 }
 0x9c3   :  { %749 = vrcp.f32 %v415_v1  ;;  %v427_v7 = vand.u32 2147483648, %v415_v1  ;;  %vm421_vm4 = vweird.f32 %v415_v1  ;;  %v425_v8 = vand.u32 2147483647, %v415_v1 }
 0x9c5   :  { %v428_v11 = vor.u32 1.1754944e-38, %v427_v7  ;;  %vm426_vm6 = vcmp.eq.f32.partialorder %v425_v8, 8.507059e+37 }
 0x9c9   :  { %v750_v2 = vpop.eup %749 }
 0x9ca   :  { %v417_v3 = vmul.f32 %v750_v2, %v415_v1  ;;  %vm422_vm3 = vweird.f32 %v750_v2 }
 0x9cb   :  { %vm423_vm5 = vmor %vm421_vm4, %vm422_vm3  ;;  %vm666_vm3 = vcmask 261127  }
 0x9cc   :  { %v418_v4 = vsub.f32 1.0, %v417_v3 }
 0x9ce   :  { %v419_v5 = vmul.f32 %v750_v2, %v418_v4 }
 0x9d0   :  { %v420_v6 = vadd.f32 %v750_v2, %v419_v5 }
 0x9d2   :  { %v424_v9 = vsel %vm423_vm5, %v750_v2, %v420_v6 }
 0x9d3   :  { %v429_v13 = vsel %vm426_vm6, %v428_v11, %v424_v9 }
 0x9d4   :  { %v435_v16 = vmul.f32 %v433_v15, %v429_v13 }
 0xa19   :  { %v438_v12 = vpop.permute.xlu2 %437 }
 0xa1a   :  { %v440_v14 = vmul.f32 %v438_v12, %v429_v13 }
 0xa1c   :  { %442 = vrot.lane.b32.xlu0 %v440_v14, %s885_s17 }
 0xa8e   :  { %v443_v17 = vpop.permute.xlu0 %442 }
 0xa8f   :  { %v445_v18 = vadd.f32 %v443_v17, %v435_v16 }
 0xa91   :  { %751 = vtanh.f32 %v445_v18  ;;  %v503_v43 = vrot.slane %v445_v18, 7 }
 0xa97   :  { %v752_v19 = vpop.eup %751 }
 0xa98   :  { %448 = vrot.lane.b32.xlu1 %v752_v19, %s884_s14 }
 0xb0a   :  { %v449_v20 = vpop.permute.xlu1 %448 }
 0xb0b   :  { %v451_v21 = vmul.f32 %v449_v20, %v429_v13 }
 0xb0d   :  { %v453_v22 = vrot.slane %v451_v21, 4 }
 0xb0f   :  { %454 = vrot.lane.b32.xlu2 %v453_v22, %s885_s17 }
 0xb69   :  { %v455_v23 = vpop.permute.xlu2 %454 }
 0xb6a   :  { %697 = vmatmul.msk.f32.vlgmr.msrb.gmra.mxu2 %vm106_vm1, %v455_v23 }
 0xbed   :  { %v475_v24 = vpop.f32.mrf.mxu2 }
 0xbee   :  { %v479_v25 = vrot.slane %v475_v24, 3 }
 0xbf0   :  { %v481_v26 = vadd.f32 %v479_v25, %v938_v10 }
 0xbf2   :  { %753 = vtanh.f32 %v481_v26  ;;  %v698_v28 = vmul.f32 -1.442695, %v481_v26 }
 0xbf4   :  { %755 = vpow2.f32 %v698_v28 }
 0xbf8   :  { %v754_v27 = vpop.eup %753 }
 0xbf9   :  { %507 = vrot.lane.b32.xlu0 %v754_v27, %s884_s14 }
 0xbfa   :  { %v756_v29 = vpop.eup %755 }
 0xbfb   :  { %v485_v30 = vadd.f32 1.0, %v756_v29 }
 0xbfd   :  { %757 = vrcp.f32 %v485_v30  ;;  %v497_v36 = vand.u32 2147483648, %v485_v30  ;;  %vm491_vm8 = vweird.f32 %v485_v30  ;;  %v495_v37 = vand.u32 2147483647, %v485_v30 }
 0xbff   :  { %v498_v39 = vor.u32 1.1754944e-38, %v497_v36  ;;  %vm496_vm10 = vcmp.eq.f32.partialorder %v495_v37, 8.507059e+37 }
 0xc03   :  { %v758_v31 = vpop.eup %757 }
 0xc04   :  { %v487_v32 = vmul.f32 %v758_v31, %v485_v30  ;;  %vm492_vm7 = vweird.f32 %v758_v31 }
 0xc05   :  { %vm493_vm9 = vmor %vm491_vm8, %vm492_vm7 }
 0xc06   :  { %v488_v33 = vsub.f32 1.0, %v487_v32 }
 0xc08   :  { %v489_v34 = vmul.f32 %v758_v31, %v488_v33 }
 0xc0a   :  { %v490_v35 = vadd.f32 %v758_v31, %v489_v34 }
 0xc0c   :  { %v494_v38 = vsel %vm493_vm9, %v758_v31, %v490_v35 }
 0xc0d   :  { %v499_v41 = vsel %vm496_vm10, %v498_v39, %v494_v38 }
 0xc0e   :  { %v505_v44 = vmul.f32 %v503_v43, %v499_v41 }
 0xc6b   :  { %v508_v40 = vpop.permute.xlu0 %507 }
 0xc6c   :  { %v510_v42 = vmul.f32 %v508_v40, %v499_v41 }
 0xc6e   :  { %512 = vrot.lane.b32.xlu1 %v510_v42, %s885_s17 }
 0xce0   :  { %v513_v45 = vpop.permute.xlu1 %512 }
 0xce1   :  { %v515_v46 = vadd.f32 %v513_v45, %v505_v44 }
 0xce3   :  { %759 = vtanh.f32 %v515_v46  ;;  %v573_v7 = vrot.slane %v515_v46, 7 }
 0xce9   :  { %v760_v47 = vpop.eup %759 }
 0xcea   :  { %518 = vrot.lane.b32.xlu2 %v760_v47, %s884_s14 }
 0xd44   :  { %v519_v48 = vpop.permute.xlu2 %518 }
 0xd45   :  { %v521_v49 = vmul.f32 %v519_v48, %v499_v41 }
 0xd47   :  { %v523_v50 = vrot.slane %v521_v49, 5 }
 0xd49   :  { %524 = vrot.lane.b32.xlu0 %v523_v50, %s885_s17 }
 0xdbb   :  { %v525_v51 = vpop.permute.xlu0 %524 }
 0xdbc   :  { %699 = vmatmul.msk.f32.vlgmr.msrb.gmra.mxu3 %vm106_vm1, %v525_v51 }
 0xe3f   :  { %v545_v52 = vpop.f32.mrf.mxu3 }
 0xe40   :  { %v549_v53 = vrot.slane %v545_v52, 2 }
 0xe42   :  { %v551_v54 = vadd.f32 %v549_v53, %v938_v10 }
 0xe44   :  { %761 = vtanh.f32 %v551_v54  ;;  %v700_v56 = vmul.f32 -1.442695, %v551_v54 }
 0xe46   :  { %763 = vpow2.f32 %v700_v56 }
 0xe4a   :  { %v762_v55 = vpop.eup %761 }
 0xe4b   :  { %577 = vrot.lane.b32.xlu1 %v762_v55, %s884_s14 }
 0xe4c   :  { %v764_v57 = vpop.eup %763 }
 0xe4d   :  { %v555_v58 = vadd.f32 1.0, %v764_v57 }
 0xe4f   :  { %765 = vrcp.f32 %v555_v58  ;;  %v567_v0 = vand.u32 2147483648, %v555_v58  ;;  %vm561_vm12 = vweird.f32 %v555_v58  ;;  %v565_v1 = vand.u32 2147483647, %v555_v58 }
 0xe51   :  { %v568_v3 = vor.u32 1.1754944e-38, %v567_v0  ;;  %vm566_vm14 = vcmp.eq.f32.partialorder %v565_v1, 8.507059e+37 }
 0xe55   :  { %v766_v59 = vpop.eup %765 }
 0xe56   :  { %v557_v60 = vmul.f32 %v766_v59, %v555_v58  ;;  %vm562_vm11 = vweird.f32 %v766_v59 }
 0xe57   :  { %vm563_vm13 = vmor %vm561_vm12, %vm562_vm11 }
 0xe58   :  { %v558_v61 = vsub.f32 1.0, %v557_v60 }
 0xe5a   :  { %v559_v62 = vmul.f32 %v766_v59, %v558_v61 }
 0xe5c   :  { %v560_v63 = vadd.f32 %v766_v59, %v559_v62 }
 0xe5e   :  { %v564_v2 = vsel %vm563_vm13, %v766_v59, %v560_v63 }
 0xe5f   :  { %v569_v5 = vsel %vm566_vm14, %v568_v3, %v564_v2 }
 0xe60   :  { %v575_v8 = vmul.f32 %v573_v7, %v569_v5 }
 0xebd   :  { %v578_v4 = vpop.permute.xlu1 %577 }
 0xebe   :  { %v580_v6 = vmul.f32 %v578_v4, %v569_v5 }
 0xec0   :  { %582 = vrot.lane.b32.xlu2 %v580_v6, %s885_s17 }
 0xf1a   :  { %v583_v9 = vpop.permute.xlu2 %582 }
 0xf1b   :  { %v585_v11 = vadd.f32 %v583_v9, %v575_v8 }
 0xf1d   :  { %767 = vtanh.f32 %v585_v11  ;;  %v643_v35 = vrot.slane %v585_v11, 7 }
 0xf23   :  { %v768_v12 = vpop.eup %767 }
 0xf24   :  { %588 = vrot.lane.b32.xlu0 %v768_v12, %s884_s14 }
 0xf96   :  { %v589_v13 = vpop.permute.xlu0 %588 }
 0xf97   :  { %v591_v14 = vmul.f32 %v589_v13, %v569_v5 }
 0xf99   :  { %v593_v15 = vrot.slane %v591_v14, 6 }
 0xf9b   :  { %594 = vrot.lane.b32.xlu1 %v593_v15, %s885_s17 }
0x100d   :  { %v595_v16 = vpop.permute.xlu1 %594 }
0x100e   :  { %701 = vmatmul.msk.f32.vlgmr.msra.gmra.mxu0 %vm106_vm1, %v595_v16 }
0x108b   :  { %v615_v17 = vpop.f32.mrf.mxu0 }
0x108c   :  { %v619_v18 = vrot.slane %v615_v17, 1 }
0x108e   :  { %v621_v19 = vadd.f32 %v619_v18, %v938_v10 }
0x1090   :  { %769 = vtanh.f32 %v621_v19  ;;  %v702_v21 = vmul.f32 -1.442695, %v621_v19 }
0x1092   :  { %771 = vpow2.f32 %v702_v21 }
0x1096   :  { %v770_v20 = vpop.eup %769 }
0x1097   :  { %647 = vrot.lane.b32.xlu2 %v770_v20, %s884_s14 }
0x1098   :  { %v772_v22 = vpop.eup %771 }
0x1099   :  { %v625_v23 = vadd.f32 1.0, %v772_v22 }
0x109b   :  { %773 = vrcp.f32 %v625_v23  ;;  %v637_v29 = vand.u32 2147483648, %v625_v23  ;;  %vm631_vm1 = vweird.f32 %v625_v23  ;;  %v635_v30 = vand.u32 2147483647, %v625_v23 }
0x109d   :  { %v638_v31 = vor.u32 1.1754944e-38, %v637_v29  ;;  %vm636_vm2 = vcmp.eq.f32.partialorder %v635_v30, 8.507059e+37 }
0x10a1   :  { %v774_v24 = vpop.eup %773 }
0x10a2   :  { %v627_v25 = vmul.f32 %v774_v24, %v625_v23  ;;  %vm632_vm15 = vweird.f32 %v774_v24 }
0x10a3   :  { %vm633_vm0 = vmor %vm631_vm1, %vm632_vm15 }
0x10a4   :  { %v628_v26 = vsub.f32 1.0, %v627_v25 }
0x10a6   :  { %v629_v27 = vmul.f32 %v774_v24, %v628_v26 }
0x10a8   :  { %v630_v28 = vadd.f32 %v774_v24, %v629_v27 }
0x10aa   :  { %v634_v10 = vsel %vm633_vm0, %v774_v24, %v630_v28 }
0x10ab   :  { %v639_v33 = vsel %vm636_vm2, %v638_v31, %v634_v10 }
0x10ac   :  { %v645_v36 = vmul.f32 %v643_v35, %v639_v33 }
0x10f1   :  { %v648_v32 = vpop.permute.xlu2 %647 }
0x10f2   :  { %v650_v34 = vmul.f32 %v648_v32, %v639_v33 }
0x10f4   :  { %652 = vrot.lane.b32.xlu0 %v650_v34, %s885_s17 }
0x1166   :  { %v653_v37 = vpop.permute.xlu0 %652 }
0x1167   :  { %v655_v38 = vadd.f32 %v653_v37, %v645_v36 }
0x1169   :  { %775 = vtanh.f32 %v655_v38 }
0x116f   :  { %v776_v39 = vpop.eup %775 }
0x1170   :  { %658 = vrot.lane.b32.xlu1 %v776_v39, %s884_s14 }
0x11e2   :  { %v659_v40 = vpop.permute.xlu1 %658 }
0x11e3   :  { %v661_v41 = vmul.f32 %v659_v40, %v639_v33 }
0x11e5   :  { %663 = vrot.lane.b32.xlu2 %v661_v41, %s885_s17 }
0x123f   :  { %v664_v42 = vpop.permute.xlu2 %663 }
0x1240   :  { %667 = vst.msk [vmem:[#allocation8 - $0x7] sm:$0x80] %vm666_vm3, %v664_v42 }
0x1241   :  { %678 = dma.vmem_to_hbm [thread:$0]  %s674_s5, 16, %s676_s20, [#allocation4]  }
0x1242   :  { %877 = dma.done.wait [#allocation4], 16  }
0x1243   :  { %878 = vsyncadd [#allocation4], 4294967280 }
0x1244   :  { %683 = vsyncpa [#allocation3], 1 }
0x1245   :  { %684 = vsyncpa [#allocation6], 1 }
0x1246   :  { %685 = vsyncpa [#allocation4], 1 }

</bundles_post_ra>
